<compile_context>
chip_gen: v7x
topology: tpu7x:2x2x1
jax: 0.10.0
libtpu: 0.0.40
codegen_flags: <defaults>
</compile_context>

<pallas_src>
import functools

import jax
import jax.numpy as jnp
from jax.experimental import pallas as pl
from jax.experimental.pallas import tpu as pltpu

# Module hyper-parameters (the original script's globals num_inputs /
# num_hiddens / num_outputs — chosen small & TPU-tile friendly).
NUM_INPUTS = 256
NUM_HIDDENS = 128
NUM_OUTPUTS = 10
OUT_PAD = 128            # lane-dense padded output width
DROPOUT_P = 0.7          # dropout3 in the original script
KEEP_PROB = 1.0 - DROPOUT_P
# keep element  <=>  hash_bits < KEEP_PROB * 2^32   (integer-domain compare)
_KEEP_THRESHOLD_U32 = int(round(KEEP_PROB * (1 << 32))) & 0xFFFFFFFF

_SALT_L1 = 0x243F6A88
_SALT_L2 = 0x13198A2E


def _round_up(n, m):
    return ((n + m - 1) // m) * m


def _hash_u32(x):
    """lowbias32-style avalanche hash on uint32 (pure jnp, lowers everywhere)."""
    x = x ^ (x >> 16)
    x = x * jnp.uint32(0x7FEB352D)
    x = x ^ (x >> 15)
    x = x * jnp.uint32(0x846CA68B)
    x = x ^ (x >> 16)
    return x


def _keep_mask(shape, seed_u32, row_offset_u32, salt):
    """Bernoulli(keep) mask keyed on (seed, layer salt, global element index)."""
    rows = jax.lax.broadcasted_iota(jnp.int32, shape, 0).astype(jnp.uint32)
    cols = jax.lax.broadcasted_iota(jnp.int32, shape, 1).astype(jnp.uint32)
    idx = (rows + row_offset_u32) * jnp.uint32(shape[1]) + cols
    key = (idx * jnp.uint32(0x9E3779B9)
           + seed_u32 * jnp.uint32(0x85EBCA6B)
           + jnp.uint32(salt))
    bits = _hash_u32(key)
    return bits < jnp.uint32(_KEEP_THRESHOLD_U32)


def _mlp_kernel(seed_ref, x_ref, w1_ref, b1_ref, w2_ref, b2_ref, w3_ref,
                b3_ref, o_ref, *, training: bool, tile_b: int):
    compute_dtype = w1_ref.dtype

    if training:
        seed_u = seed_ref[0].astype(jnp.uint32)
        row0 = (pl.program_id(0) * tile_b).astype(jnp.uint32)

    # hidden1 + ReLU + dropout (survivor scale folded into w2 in the wrapper)
    h = jnp.dot(x_ref[...], w1_ref[...],
                preferred_element_type=jnp.float32) + b1_ref[...]
    h = jnp.maximum(h, 0.0)
    if training:
        h = jnp.where(_keep_mask(h.shape, seed_u, row0, _SALT_L1), h, 0.0)
    h = h.astype(compute_dtype)

    # hidden2 + ReLU + dropout (survivor scale folded into w3 in the wrapper)
    h = jnp.dot(h, w2_ref[...],
                preferred_element_type=jnp.float32) + b2_ref[...]
    h = jnp.maximum(h, 0.0)
    if training:
        h = jnp.where(_keep_mask(h.shape, seed_u, row0, _SALT_L2), h, 0.0)
    h = h.astype(compute_dtype)

    # output layer (padded to 128 lanes -> dense, unmasked stores)
    o_ref[...] = (jnp.dot(h, w3_ref[...],
                          preferred_element_type=jnp.float32)
                  + b3_ref[...]).astype(o_ref.dtype)


def classification_forward(x, params, seed: int = 0, training: bool = True,
                           tile_b: int = 512,
                           compute_dtype=jnp.bfloat16):
    """Fused forward pass. x: (B, NUM_INPUTS) float32 -> (B, NUM_OUTPUTS) f32."""
    w1, b1, w2, b2, w3, b3 = params
    batch = x.shape[0]

    # Fold the 1/keep inverted-dropout rescale into the next layer's weights.
    if training:
        w2 = w2 * (1.0 / KEEP_PROB)
        w3 = w3 * (1.0 / KEEP_PROB)

    # Pad the 10-wide output layer to a lane-dense 128 columns.
    w3p = jnp.zeros((NUM_HIDDENS, OUT_PAD), w3.dtype).at[:, :NUM_OUTPUTS].set(w3)
    b3p = jnp.zeros((1, OUT_PAD), b3.dtype).at[:, :NUM_OUTPUTS].set(b3)

    # bf16 streaming of x / weights, f32 biases + f32 MXU accumulation.
    xc = x.astype(compute_dtype)
    w1c, w2c, w3c = (w.astype(compute_dtype) for w in (w1, w2, w3p))
    b1c, b2c, b3c = (b.astype(jnp.float32) for b in (b1, b2, b3p))

    # Batch tiling: pick the tile, pad ragged batches in the wrapper.
    tb = min(tile_b, _round_up(batch, 8))
    b_pad = _round_up(batch, tb)
    if b_pad != batch:
        xc = jnp.pad(xc, ((0, b_pad - batch), (0, 0)))

    seed_arr = jnp.asarray([seed], dtype=jnp.int32)
    kernel = functools.partial(_mlp_kernel, training=training, tile_b=tb)

    smem = pl.BlockSpec(memory_space=pltpu.MemorySpace.SMEM)
    out_pad = pl.pallas_call(
        kernel,
        out_shape=jax.ShapeDtypeStruct((b_pad, OUT_PAD), jnp.float32),
        grid=(b_pad // tb,),
        in_specs=[
            smem,                                                       # seed
            pl.BlockSpec((tb, NUM_INPUTS), lambda i: (i, 0)),           # x tile
            pl.BlockSpec((NUM_INPUTS, NUM_HIDDENS), lambda i: (0, 0)),  # w1
            pl.BlockSpec((1, NUM_HIDDENS), lambda i: (0, 0)),           # b1
            pl.BlockSpec((NUM_HIDDENS, NUM_HIDDENS), lambda i: (0, 0)),  # w2
            pl.BlockSpec((1, NUM_HIDDENS), lambda i: (0, 0)),           # b2
            pl.BlockSpec((NUM_HIDDENS, OUT_PAD), lambda i: (0, 0)),     # w3 (pad)
            pl.BlockSpec((1, OUT_PAD), lambda i: (0, 0)),               # b3 (pad)
        ],
        out_specs=pl.BlockSpec((tb, OUT_PAD), lambda i: (i, 0)),
        compiler_params=pltpu.CompilerParams(
            dimension_semantics=("parallel",),
            vmem_limit_bytes=32 * 1024 * 1024,
        ),
    )(seed_arr, xc, w1c, b1c, w2c, b2c, w3c, b3c)

    return out_pad[:batch, :NUM_OUTPUTS]


def init_params(key):
    """Deterministic parameter init (shapes match the torch module)."""
    k1, k2, k3 = jax.random.split(key, 3)

    def linear(k, fan_in, fan_out):
        # torch.nn.Linear default: U(-1/sqrt(fan_in), 1/sqrt(fan_in))
        bound = 1.0 / jnp.sqrt(fan_in)
        kw, kb = jax.random.split(k)
        w = jax.random.uniform(kw, (fan_in, fan_out), jnp.float32,
                               -bound, bound)
        b = jax.random.uniform(kb, (1, fan_out), jnp.float32, -bound, bound)
        return w, b

    w1, b1 = linear(k1, NUM_INPUTS, NUM_HIDDENS)
    w2, b2 = linear(k2, NUM_HIDDENS, NUM_HIDDENS)
    w3, b3 = linear(k3, NUM_HIDDENS, NUM_OUTPUTS)
    return (w1, b1, w2, b2, w3, b3)


if __name__ == "__main__":
    key = jax.random.PRNGKey(0)
    kx, kp = jax.random.split(key)

    batch = 8
    x = jax.random.normal(kx, (batch, NUM_INPUTS), dtype=jnp.float32)
    params = init_params(kp)

    # training-mode forward (dropout active, deterministic for a fixed seed)
    out_train = classification_forward(x, params, seed=0, training=True)
    out_train = jax.block_until_ready(out_train)
    assert out_train.shape == (batch, NUM_OUTPUTS)
    assert bool(jnp.all(jnp.isfinite(out_train)))

    # same seed -> identical dropout masks -> identical output
    out_train2 = jax.block_until_ready(
        classification_forward(x, params, seed=0, training=True))
    assert bool(jnp.array_equal(out_train, out_train2))

    # eval-mode forward (dropout = identity) — check against a pure-JAX
    # reference computed with the same bf16-stream / f32-accumulate recipe.
    out_eval = jax.block_until_ready(
        classification_forward(x, params, seed=0, training=False))
    w1, b1, w2, b2, w3, b3 = params
    xb = x.astype(jnp.bfloat16)
    h = jnp.dot(xb, w1.astype(jnp.bfloat16),
                preferred_element_type=jnp.float32) + b1
    h = jnp.maximum(h, 0.0).astype(jnp.bfloat16)
    h = jnp.dot(h, w2.astype(jnp.bfloat16),
                preferred_element_type=jnp.float32) + b2
    h = jnp.maximum(h, 0.0).astype(jnp.bfloat16)
    ref = jnp.dot(h, w3.astype(jnp.bfloat16),
                  preferred_element_type=jnp.float32) + b3
    assert jnp.allclose(out_eval, ref, atol=2e-2, rtol=2e-2)

    print("KERNEL_OK")
</pallas_src>

<mosaic_0001>
module attributes {stable_mosaic.version = 11 : i64} {
  func.func @_mlp_kernel(%arg0: i32, %arg1: memref<1xi32, #tpu.memory_space<smem>>, %arg2: memref<8x256xbf16, #tpu.memory_space<vmem>>, %arg3: memref<256x128xbf16, #tpu.memory_space<vmem>>, %arg4: memref<1x128xf32, #tpu.memory_space<vmem>>, %arg5: memref<128x128xbf16, #tpu.memory_space<vmem>>, %arg6: memref<1x128xf32, #tpu.memory_space<vmem>>, %arg7: memref<128x128xbf16, #tpu.memory_space<vmem>>, %arg8: memref<1x128xf32, #tpu.memory_space<vmem>>, %arg9: memref<8x128xf32, #tpu.memory_space<vmem>>) attributes {dimension_semantics = [#tpu.dimension_semantics<parallel>], iteration_bounds = array<i64: 1>, scalar_prefetch = 0 : i64, scratch_operands = 0 : i64, tpu.core_type = #tpu.core_type<tc>, window_params = [{transform_indices = @transform_0, window_bounds = array<i64: 1>}, {transform_indices = @transform_1, window_bounds = array<i64: 8, 256>}, {pipeline_mode = #tpu.pipeline_mode<synchronous>, transform_indices = @transform_2, window_bounds = array<i64: 256, 128>}, {pipeline_mode = #tpu.pipeline_mode<synchronous>, transform_indices = @transform_3, window_bounds = array<i64: 1, 128>}, {pipeline_mode = #tpu.pipeline_mode<synchronous>, transform_indices = @transform_4, window_bounds = array<i64: 128, 128>}, {pipeline_mode = #tpu.pipeline_mode<synchronous>, transform_indices = @transform_5, window_bounds = array<i64: 1, 128>}, {pipeline_mode = #tpu.pipeline_mode<synchronous>, transform_indices = @transform_6, window_bounds = array<i64: 128, 128>}, {pipeline_mode = #tpu.pipeline_mode<synchronous>, transform_indices = @transform_7, window_bounds = array<i64: 1, 128>}, {transform_indices = @transform_8, window_bounds = array<i64: 8, 128>}]} {
    %c0 = arith.constant 0 : index
    %0 = memref.load %arg1[%c0] : memref<1xi32, #tpu.memory_space<smem>>
    %c8_i32 = arith.constant 8 : i32
    %1 = arith.muli %arg0, %c8_i32 : i32
    %c0_0 = arith.constant 0 : index
    %c0_1 = arith.constant 0 : index
    %2 = vector.load %arg2[%c0_0, %c0_1] : memref<8x256xbf16, #tpu.memory_space<vmem>>, vector<8x256xbf16>
    %c0_2 = arith.constant 0 : index
    %c0_3 = arith.constant 0 : index
    %3 = vector.load %arg3[%c0_2, %c0_3] : memref<256x128xbf16, #tpu.memory_space<vmem>>, vector<256x128xbf16>
    %cst = arith.constant dense<0.000000e+00> : vector<8x128xf32>
    %4 = tpu.matmul %2, %3, %cst {dimension_numbers = #tpu.dot_dimension_numbers<[1], [0], [0], [1], [0, 0, 1, 1], [], []>} : vector<8x256xbf16>, vector<256x128xbf16>, vector<8x128xf32> -> vector<8x128xf32>
    %c0_4 = arith.constant 0 : index
    %c0_5 = arith.constant 0 : index
    %5 = vector.load %arg4[%c0_4, %c0_5] : memref<1x128xf32, #tpu.memory_space<vmem>>, vector<1x128xf32>
    %6 = vector.broadcast %5 : vector<1x128xf32> to vector<8x128xf32>
    %7 = arith.addf %4, %6 : vector<8x128xf32>
    %cst_6 = arith.constant 0.000000e+00 : f32
    %8 = vector.broadcast %cst_6 : f32 to vector<8x128xf32>
    %9 = arith.maximumf %7, %8 : vector<8x128xf32>
    %10 = tpu.iota {dimensions = array<i32: 0>} : vector<8x128xi32>
    %11 = tpu.iota {dimensions = array<i32: 1>} : vector<8x128xi32>
    %12 = vector.broadcast %1 : i32 to vector<8x128xi32>
    %13 = arith.addi %10, %12 : vector<8x128xi32>
    %c128_i32 = arith.constant 128 : i32
    %14 = vector.broadcast %c128_i32 : i32 to vector<8x128xi32>
    %15 = arith.muli %13, %14 : vector<8x128xi32>
    %16 = arith.addi %15, %11 : vector<8x128xi32>
    %c-1640531527_i32 = arith.constant -1640531527 : i32
    %17 = vector.broadcast %c-1640531527_i32 : i32 to vector<8x128xi32>
    %18 = arith.muli %16, %17 : vector<8x128xi32>
    %c-2048144789_i32 = arith.constant -2048144789 : i32
    %19 = arith.muli %0, %c-2048144789_i32 : i32
    %20 = vector.broadcast %19 : i32 to vector<8x128xi32>
    %21 = arith.addi %18, %20 : vector<8x128xi32>
    %c608135816_i32 = arith.constant 608135816 : i32
    %22 = vector.broadcast %c608135816_i32 : i32 to vector<8x128xi32>
    %23 = arith.addi %21, %22 : vector<8x128xi32>
    %c16_i32 = arith.constant 16 : i32
    %24 = vector.broadcast %c16_i32 : i32 to vector<8x128xi32>
    %25 = arith.shrui %23, %24 : vector<8x128xi32>
    %26 = arith.xori %23, %25 : vector<8x128xi32>
    %c2146121005_i32 = arith.constant 2146121005 : i32
    %27 = vector.broadcast %c2146121005_i32 : i32 to vector<8x128xi32>
    %28 = arith.muli %26, %27 : vector<8x128xi32>
    %c15_i32 = arith.constant 15 : i32
    %29 = vector.broadcast %c15_i32 : i32 to vector<8x128xi32>
    %30 = arith.shrui %28, %29 : vector<8x128xi32>
    %31 = arith.xori %28, %30 : vector<8x128xi32>
    %c-2073254261_i32 = arith.constant -2073254261 : i32
    %32 = vector.broadcast %c-2073254261_i32 : i32 to vector<8x128xi32>
    %33 = arith.muli %31, %32 : vector<8x128xi32>
    %c16_i32_7 = arith.constant 16 : i32
    %34 = vector.broadcast %c16_i32_7 : i32 to vector<8x128xi32>
    %35 = arith.shrui %33, %34 : vector<8x128xi32>
    %36 = arith.xori %33, %35 : vector<8x128xi32>
    %c1288490189_i32 = arith.constant 1288490189 : i32
    %37 = vector.broadcast %c1288490189_i32 : i32 to vector<8x128xi32>
    %38 = arith.cmpi ult, %36, %37 : vector<8x128xi32>
    %cst_8 = arith.constant 0.000000e+00 : f32
    %39 = vector.broadcast %cst_8 : f32 to vector<8x128xf32>
    %40 = arith.select %38, %9, %39 : vector<8x128xi1>, vector<8x128xf32>
    %41 = arith.truncf %40 : vector<8x128xf32> to vector<8x128xbf16>
    %c0_9 = arith.constant 0 : index
    %c0_10 = arith.constant 0 : index
    %42 = vector.load %arg5[%c0_9, %c0_10] : memref<128x128xbf16, #tpu.memory_space<vmem>>, vector<128x128xbf16>
    %cst_11 = arith.constant dense<0.000000e+00> : vector<8x128xf32>
    %43 = tpu.matmul %41, %42, %cst_11 {dimension_numbers = #tpu.dot_dimension_numbers<[1], [0], [0], [1], [0, 0, 1, 1], [], []>} : vector<8x128xbf16>, vector<128x128xbf16>, vector<8x128xf32> -> vector<8x128xf32>
    %c0_12 = arith.constant 0 : index
    %c0_13 = arith.constant 0 : index
    %44 = vector.load %arg6[%c0_12, %c0_13] : memref<1x128xf32, #tpu.memory_space<vmem>>, vector<1x128xf32>
    %45 = vector.broadcast %44 : vector<1x128xf32> to vector<8x128xf32>
    %46 = arith.addf %43, %45 : vector<8x128xf32>
    %cst_14 = arith.constant 0.000000e+00 : f32
    %47 = vector.broadcast %cst_14 : f32 to vector<8x128xf32>
    %48 = arith.maximumf %46, %47 : vector<8x128xf32>
    %49 = tpu.iota {dimensions = array<i32: 0>} : vector<8x128xi32>
    %50 = tpu.iota {dimensions = array<i32: 1>} : vector<8x128xi32>
    %51 = vector.broadcast %1 : i32 to vector<8x128xi32>
    %52 = arith.addi %49, %51 : vector<8x128xi32>
    %c128_i32_15 = arith.constant 128 : i32
    %53 = vector.broadcast %c128_i32_15 : i32 to vector<8x128xi32>
    %54 = arith.muli %52, %53 : vector<8x128xi32>
    %55 = arith.addi %54, %50 : vector<8x128xi32>
    %c-1640531527_i32_16 = arith.constant -1640531527 : i32
    %56 = vector.broadcast %c-1640531527_i32_16 : i32 to vector<8x128xi32>
    %57 = arith.muli %55, %56 : vector<8x128xi32>
    %c-2048144789_i32_17 = arith.constant -2048144789 : i32
    %58 = arith.muli %0, %c-2048144789_i32_17 : i32
    %59 = vector.broadcast %58 : i32 to vector<8x128xi32>
    %60 = arith.addi %57, %59 : vector<8x128xi32>
    %c320440878_i32 = arith.constant 320440878 : i32
    %61 = vector.broadcast %c320440878_i32 : i32 to vector<8x128xi32>
    %62 = arith.addi %60, %61 : vector<8x128xi32>
    %c16_i32_18 = arith.constant 16 : i32
    %63 = vector.broadcast %c16_i32_18 : i32 to vector<8x128xi32>
    %64 = arith.shrui %62, %63 : vector<8x128xi32>
    %65 = arith.xori %62, %64 : vector<8x128xi32>
    %c2146121005_i32_19 = arith.constant 2146121005 : i32
    %66 = vector.broadcast %c2146121005_i32_19 : i32 to vector<8x128xi32>
    %67 = arith.muli %65, %66 : vector<8x128xi32>
    %c15_i32_20 = arith.constant 15 : i32
    %68 = vector.broadcast %c15_i32_20 : i32 to vector<8x128xi32>
    %69 = arith.shrui %67, %68 : vector<8x128xi32>
    %70 = arith.xori %67, %69 : vector<8x128xi32>
    %c-2073254261_i32_21 = arith.constant -2073254261 : i32
    %71 = vector.broadcast %c-2073254261_i32_21 : i32 to vector<8x128xi32>
    %72 = arith.muli %70, %71 : vector<8x128xi32>
    %c16_i32_22 = arith.constant 16 : i32
    %73 = vector.broadcast %c16_i32_22 : i32 to vector<8x128xi32>
    %74 = arith.shrui %72, %73 : vector<8x128xi32>
    %75 = arith.xori %72, %74 : vector<8x128xi32>
    %c1288490189_i32_23 = arith.constant 1288490189 : i32
    %76 = vector.broadcast %c1288490189_i32_23 : i32 to vector<8x128xi32>
    %77 = arith.cmpi ult, %75, %76 : vector<8x128xi32>
    %cst_24 = arith.constant 0.000000e+00 : f32
    %78 = vector.broadcast %cst_24 : f32 to vector<8x128xf32>
    %79 = arith.select %77, %48, %78 : vector<8x128xi1>, vector<8x128xf32>
    %80 = arith.truncf %79 : vector<8x128xf32> to vector<8x128xbf16>
    %c0_25 = arith.constant 0 : index
    %c0_26 = arith.constant 0 : index
    %81 = vector.load %arg7[%c0_25, %c0_26] : memref<128x128xbf16, #tpu.memory_space<vmem>>, vector<128x128xbf16>
    %cst_27 = arith.constant dense<0.000000e+00> : vector<8x128xf32>
    %82 = tpu.matmul %80, %81, %cst_27 {dimension_numbers = #tpu.dot_dimension_numbers<[1], [0], [0], [1], [0, 0, 1, 1], [], []>} : vector<8x128xbf16>, vector<128x128xbf16>, vector<8x128xf32> -> vector<8x128xf32>
    %c0_28 = arith.constant 0 : index
    %c0_29 = arith.constant 0 : index
    %83 = vector.load %arg8[%c0_28, %c0_29] : memref<1x128xf32, #tpu.memory_space<vmem>>, vector<1x128xf32>
    %84 = vector.broadcast %83 : vector<1x128xf32> to vector<8x128xf32>
    %85 = arith.addf %82, %84 : vector<8x128xf32>
    %c0_30 = arith.constant 0 : index
    %c0_31 = arith.constant 0 : index
    %86 = vector.load %arg9[%c0_30, %c0_31] : memref<8x128xf32, #tpu.memory_space<vmem>>, vector<8x128xf32>
    tpu.vector_store %arg9[%c0_30, %c0_31], %85 {strides = array<i32>} : memref<8x128xf32, #tpu.memory_space<vmem>>, vector<8x128xf32>,
    return
  }
  func.func @transform_0(%arg0: i32) -> i32 {
    %c0_i32 = arith.constant 0 : i32
    %c0_i32_0 = arith.constant 0 : i32
    return %c0_i32 : i32
  }
  func.func @transform_1(%arg0: i32) -> (i32, i32) {
    %c0_i32 = arith.constant 0 : i32
    %c0_i32_0 = arith.constant 0 : i32
    return %arg0, %c0_i32 : i32, i32
  }
  func.func @transform_2(%arg0: i32) -> (i32, i32) {
    %c0_i32 = arith.constant 0 : i32
    %c0_i32_0 = arith.constant 0 : i32
    %c0_i32_1 = arith.constant 0 : i32
    return %c0_i32, %c0_i32_0 : i32, i32
  }
  func.func @transform_3(%arg0: i32) -> (i32, i32) {
    %c0_i32 = arith.constant 0 : i32
    %c0_i32_0 = arith.constant 0 : i32
    %c0_i32_1 = arith.constant 0 : i32
    return %c0_i32, %c0_i32_0 : i32, i32
  }
  func.func @transform_4(%arg0: i32) -> (i32, i32) {
    %c0_i32 = arith.constant 0 : i32
    %c0_i32_0 = arith.constant 0 : i32
    %c0_i32_1 = arith.constant 0 : i32
    return %c0_i32, %c0_i32_0 : i32, i32
  }
  func.func @transform_5(%arg0: i32) -> (i32, i32) {
    %c0_i32 = arith.constant 0 : i32
    %c0_i32_0 = arith.constant 0 : i32
    %c0_i32_1 = arith.constant 0 : i32
    return %c0_i32, %c0_i32_0 : i32, i32
  }
  func.func @transform_6(%arg0: i32) -> (i32, i32) {
    %c0_i32 = arith.constant 0 : i32
    %c0_i32_0 = arith.constant 0 : i32
    %c0_i32_1 = arith.constant 0 : i32
    return %c0_i32, %c0_i32_0 : i32, i32
  }
  func.func @transform_7(%arg0: i32) -> (i32, i32) {
    %c0_i32 = arith.constant 0 : i32
    %c0_i32_0 = arith.constant 0 : i32
    %c0_i32_1 = arith.constant 0 : i32
    return %c0_i32, %c0_i32_0 : i32, i32
  }
  func.func @transform_8(%arg0: i32) -> (i32, i32) {
    %c0_i32 = arith.constant 0 : i32
    %c0_i32_0 = arith.constant 0 : i32
    return %arg0, %c0_i32 : i32, i32
  }
}

</mosaic_0001>

<bundles_post_ra>
// kernel: tpu_custom_call.1
= control target key start
LH: loop header
LB: loop body
LE: loop exit
PB: predicated region body
PF: predicated region fallthrough
CT: control target
= control target key end

     0   :  { %14 = vsyncpa [#allocation4], 0  ;;  %s985_s0 = inlined_call_operand.<no memory space> [shape: s32[1], index: 0, kind: input, shape index: {}]   ;;  %s986_s1 = inlined_call_operand.hbm [shape: bf16[8,256], index: 1, kind: input, shape index: {}]   ;;  %s987_s2 = inlined_call_operand.hbm [shape: bf16[256,128], index: 2, kind: input, shape index: {}]   ;;  %s988_s3 = inlined_call_operand.vmem [shape: f32[1,128], index: 3, kind: input, shape index: {}]   ;;  %s989_s4 = inlined_call_operand.hbm [shape: bf16[128,128], index: 4, kind: input, shape index: {}]   ;;  %s990_s5 = inlined_call_operand.vmem [shape: f32[1,128], index: 5, kind: input, shape index: {}]   ;;  %s991_s6 = inlined_call_operand.hbm [shape: bf16[128,128], index: 6, kind: input, shape index: {}]   ;;  %s992_s7 = inlined_call_operand.vmem [shape: f32[1,128], index: 7, kind: input, shape index: {}]   ;;  %s993_s8 = inlined_call_operand.hbm [shape: f32[8,128], index: 8, kind: output, shape index: {}]  }
   0x1   :  { %15 = vsyncpa [#allocation7], 0 }
   0x2   :  { %16 = vsyncpa [#allocation10], 0 }
   0x3   :  { %17 = vsyncpa [#allocation5], 0  ;;  %s832_s27 = smov [#allocation6]   ;;  %s714_s9 = scalar_lea.hbm %s987_s2, 2048 }
   0x4   :  { %s35_s28 = sshll.u32 %s832_s27, 4  ;;  %p715_p0 = scmp.ne.s32.totalorder %s987_s2, %s714_s9  ;;  %s36_s28 = int_to_ptr.vmem [resolvable:$true] %s35_s28 }
   0x5   :  { %p718_p1 = scmp.lt.u32.totalorder %s714_s9, %s987_s2 }
   0x7   :  { %p720_p2 = pnand %p718_p1, %p715_p0 }
   0x9   :  { %723 = shalt.err (!%p720_p2)
}
   0xa   :  { %s724_s14 = scalar_lea.vmem %s36_s28, 2048  ;;  %p729_p4 = scmp.lt.s32.totalorder %s36_s28, %s36_s28 }
   0xb   :  { %p725_p3 = scmp.ne.s32.totalorder %s36_s28, %s724_s14  ;;  %p730_p5 = scmp.lt.s32.totalorder %s724_s14, %s724_s14 }
   0xd   :  { %p731_p6 = por %p730_p5, %p729_p4 }
   0xf   :  { %p732_p7 = pnand %p731_p6, %p725_p3 }
  0x11   :  { %735 = shalt.err (!%p732_p7)
}
  0x12   :  { %s833_s15 = smov 64   ;;  %s834_s16 = smov 4  }
  0x13   :  { %41 = dma.hbm_to_vmem [thread:$0]  %s987_s2, 2048, %s36_s28, [#allocation7], %s833_s15, %s833_s15, %s834_s16  }
  0x14   :  { %s835_s19 = smov [#allocation3]   ;;  %s836_s21 = smov [#allocation8]  }
  0x15   :  { %s26_s20 = sshll.u32 %s835_s19, 4  ;;  %s49_s22 = sshll.u32 %s836_s21, 4  ;;  %s27_s20 = int_to_ptr.vmem [resolvable:$true] %s26_s20  ;;  %s50_s22 = int_to_ptr.vmem [resolvable:$true] %s49_s22 }
  0x16   :  { %s736_s25 = scalar_lea.hbm %s986_s1, 128 }
  0x17   :  { %p737_p8 = scmp.ne.s32.totalorder %s986_s1, %s736_s25  ;;  %p740_p9 = scmp.lt.u32.totalorder %s736_s25, %s986_s1 }
  0x19   :  { %p742_p10 = pnand %p740_p9, %p737_p8 }
  0x1b   :  { %745 = shalt.err (!%p742_p10)
}
  0x1c   :  { %s746_s2 = scalar_lea.vmem %s27_s20, 128  ;;  %p751_p12 = scmp.lt.s32.totalorder %s27_s20, %s27_s20 }
  0x1d   :  { %p747_p11 = scmp.ne.s32.totalorder %s27_s20, %s746_s2  ;;  %p752_p13 = scmp.lt.s32.totalorder %s746_s2, %s746_s2 }
  0x1f   :  { %p753_p0 = por %p752_p13, %p751_p12 }
  0x21   :  { %p754_p1 = pnand %p753_p0, %p747_p11 }
  0x23   :  { %757 = shalt.err (!%p754_p1)
}
  0x24   :  { %29 = dma.hbm_to_vmem [thread:$0]  %s986_s1, 128, %s27_s20, [#allocation4]  }
  0x25   :  { %s758_s12 = scalar_lea.hbm %s989_s4, 1024 }
  0x26   :  { %p759_p2 = scmp.ne.s32.totalorder %s989_s4, %s758_s12  ;;  %p762_p3 = scmp.lt.u32.totalorder %s758_s12, %s989_s4 }
  0x28   :  { %p764_p4 = pnand %p762_p3, %p759_p2 }
  0x2a   :  { %767 = shalt.err (!%p764_p4)
}
  0x2b   :  { %s768_s19 = scalar_lea.vmem %s50_s22, 1024  ;;  %p773_p6 = scmp.lt.s32.totalorder %s50_s22, %s50_s22 }
  0x2c   :  { %p769_p5 = scmp.ne.s32.totalorder %s50_s22, %s768_s19  ;;  %p774_p7 = scmp.lt.s32.totalorder %s768_s19, %s768_s19 }
  0x2e   :  { %p775_p8 = por %p774_p7, %p773_p6 }
  0x30   :  { %p776_p9 = pnand %p775_p8, %p769_p5 }
  0x32   :  { %779 = shalt.err (!%p776_p9)
}
  0x33   :  { %55 = dma.hbm_to_vmem [thread:$0]  %s989_s4, 1024, %s50_s22, [#allocation7], %s833_s15, %s833_s15, %s834_s16  }
  0x34   :  { %s837_s21 = smov [#allocation9]   ;;  %s780_s26 = scalar_lea.hbm %s991_s6, 1024 }
  0x35   :  { %s63_s23 = sshll.u32 %s837_s21, 4  ;;  %p781_p10 = scmp.ne.s32.totalorder %s991_s6, %s780_s26  ;;  %s64_s23 = int_to_ptr.vmem [resolvable:$true] %s63_s23 }
  0x36   :  { %p784_p11 = scmp.lt.u32.totalorder %s780_s26, %s991_s6 }
  0x38   :  { %p786_p12 = pnand %p784_p11, %p781_p10 }
  0x3a   :  { %789 = shalt.err (!%p786_p12)
}
  0x3b   :  { %s790_s28 = scalar_lea.vmem %s64_s23, 1024  ;;  %p795_p0 = scmp.lt.s32.totalorder %s64_s23, %s64_s23 }
  0x3c   :  { %p791_p13 = scmp.ne.s32.totalorder %s64_s23, %s790_s28  ;;  %p796_p1 = scmp.lt.s32.totalorder %s790_s28, %s790_s28 }
  0x3e   :  { %p797_p2 = por %p796_p1, %p795_p0 }
  0x40   :  { %p798_p3 = pnand %p797_p2, %p791_p13 }
  0x42   :  { %801 = shalt.err (!%p798_p3)
}
  0x43   :  { %69 = dma.hbm_to_vmem [thread:$0]  %s991_s6, 1024, %s64_s23, [#allocation10], %s833_s15, %s833_s15, %s834_s16  }
  0x44   :  { %824 = dma.done.wait [#allocation4], 128  }
  0x45   :  { %825 = vsyncadd [#allocation4], 4294967168 }
  0x46   :  { %826 = dma.done.wait [#allocation7], 3072  }
  0x47   :  { %827 = vsyncadd [#allocation7], 4294964224 }
  0x48   :  { %828 = dma.done.wait [#allocation10], 1024  }
  0x49   :  { %829 = vsyncadd [#allocation10], 4294966272  ;;  %v838_v0 = vmov 0.0   ;;  %v680_v1 = vld [vmem:[#allocation6 + $0x40] sm:$0xff]   ;;  %v682_v3 = vld [vmem:[#allocation6 + $0x48] sm:$0xff]   ;;  %vm839_vm0 = vmmov 0   ;;  %v271_v34 = vlaneseq }
  0x4a   :  { %631 = vmatprep.subr.bf16.mxu1 %v838_v0  ;;  %v681_v2 = vld [vmem:[#allocation6] sm:$0xff]   ;;  %591 = vmatprep.subr.bf16.mxu0 %v680_v1  ;;  %v683_v4 = vld [vmem:[#allocation6 + $0x8] sm:$0xff]   ;;  %v684_v5 = vld [vmem:[#allocation6 + $0x50] sm:$0xff]   ;;  %s280_s16 = smul.u32 2246822507, %s985_s0  ;;  %s840_s13 = smov [#allocation11]  }
  0x4b   :  { %592 = vmatpush3.bf16.msra.mxu0 %v681_v2  ;;  %v685_v6 = vld [vmem:[#allocation6 + $0x10] sm:$0xff]   ;;  %v686_v7 = vld [vmem:[#allocation6 + $0x58] sm:$0xff]   ;;  %v688_v9 = vld [vmem:[#allocation6 + $0x60] sm:$0xff]   ;;  %647 = vmatprep.mubr.msk.bf16.mxu1 %vm839_vm0, %v838_v0  ;;  %v272_v35 = vshrl.u32 %v271_v34, 7  ;;  %v274_v36 = vand.u32 127, %v271_v34  ;;  %s537_s14 = sshll.u32 %s840_s13, 4  ;;  %s538_s14 = int_to_ptr.vmem [resolvable:$true] %s537_s14 }
  0x4c   :  { %593 = vmatprep.subr.bf16.mxu0 %v682_v3  ;;  %v687_v8 = vld [vmem:[#allocation6 + $0x18] sm:$0xff]   ;;  %v689_v10 = vld [vmem:[#allocation6 + $0x20] sm:$0xff]   ;;  %v690_v11 = vld [vmem:[#allocation6 + $0x68] sm:$0xff]   ;;  %v281_v40 = vstv %s280_s16  ;;  %p807_p5 = scmp.lt.s32.totalorder %s538_s14, %s538_s14 }
  0x4d   :  { %v87_v12 = vld [vmem:[#allocation3] sm:$0xff]  ;;  %v698_v14 = vld [vmem:[#allocation8] sm:$0xff]   ;;  %v691_v15 = vld [vmem:[#allocation6 + $0x28] sm:$0xff]   ;;  %v277_v37 = vmul.u32 128, %v272_v35 }
  0x4e   :  { %v550_v13 = vcombine.high %v87_v12, %v87_v12  ;;  %v692_v16 = vld [vmem:[#allocation6 + $0x70] sm:$0xff]   ;;  %632 = vmatpush3.bf16.msra.mxu1 %v698_v14  ;;  %v699_v17 = vld [vmem:[#allocation8 + $0x8] sm:$0xff]   ;;  %v694_v19 = vld [vmem:[#allocation6 + $0x78] sm:$0xff]   ;;  %v549_v23 = vcombine.low %v87_v12, %v87_v12 }
  0x4f   :  { %594 = vmatpush3.bf16.msra.mxu0 %v683_v4  ;;  %v693_v18 = vld [vmem:[#allocation6 + $0x30] sm:$0xff]   ;;  %633 = vmatprep.subr.bf16.mxu1 %v838_v0  ;;  %v695_v21 = vld [vmem:[#allocation6 + $0x38] sm:$0xff]   ;;  %v702_v24 = vld [vmem:[#allocation8 + $0x20] sm:$0xff]   ;;  %v278_v38 = vadd.s32 %v277_v37, %v274_v36 }
  0x50   :  { %595 = vmatprep.subr.bf16.mxu0 %v684_v5  ;;  %262 = vmatprep.mubr.bf16.mxu0 %v550_v13  ;;  %v700_v20 = vld [vmem:[#allocation8 + $0x10] sm:$0xff]   ;;  %v701_v22 = vld [vmem:[#allocation8 + $0x18] sm:$0xff]   ;;  %v703_v25 = vld [vmem:[#allocation8 + $0x28] sm:$0xff]  }
  0x51   :  { %v704_v26 = vld [vmem:[#allocation8 + $0x30] sm:$0xff]   ;;  %v705_v27 = vld [vmem:[#allocation8 + $0x38] sm:$0xff]   ;;  %v706_v28 = vld [vmem:[#allocation9] sm:$0xff]   ;;  %v279_v39 = vmul.u32 2654435769, %v278_v38 }
  0x52   :  { %634 = vmatpush3.bf16.msra.mxu1 %v699_v17  ;;  %v707_v29 = vld [vmem:[#allocation9 + $0x8] sm:$0xff]   ;;  %v708_v30 = vld [vmem:[#allocation9 + $0x10] sm:$0xff]   ;;  %v709_v31 = vld [vmem:[#allocation9 + $0x18] sm:$0xff]  }
  0x53   :  { %596 = vmatpush3.bf16.msra.mxu0 %v685_v6  ;;  %635 = vmatprep.subr.bf16.mxu1 %v838_v0  ;;  %v710_v32 = vld [vmem:[#allocation9 + $0x20] sm:$0xff]   ;;  %v711_v33 = vld [vmem:[#allocation9 + $0x28] sm:$0xff]   ;;  %v282_v41 = vadd.s32 %v281_v40, %v279_v39  ;;  %v548_v52 = vld [vmem:[%s988_s3] ss:$0 sm:$0xff] }
  0x54   :  { %597 = vmatprep.subr.bf16.mxu0 %v686_v7  ;;  %v712_v60 = vld [vmem:[#allocation9 + $0x30] sm:$0xff]   ;;  %v713_v61 = vld [vmem:[#allocation9 + $0x38] sm:$0xff]  }
  0x55   :  { %v283_v42 = vadd.s32 608135816, %v282_v41  ;;  %v407_v62 = vadd.s32 320440878, %v282_v41 }
  0x56   :  { %636 = vmatpush3.bf16.msra.mxu1 %v700_v20 }
  0x57   :  { %598 = vmatpush3.bf16.msra.mxu0 %v687_v8  ;;  %637 = vmatprep.subr.bf16.mxu1 %v838_v0  ;;  %v284_v43 = vshrl.u32 %v283_v42, 16  ;;  %v408_v63 = vshrl.u32 %v407_v62, 16  ;;  %v567_v8 = vld [vmem:[%s990_s5] ss:$0 sm:$0xff]  ;;  %s802_s5 = scalar_lea.vmem %s538_s14, 128 }
  0x58   :  { %599 = vmatprep.subr.bf16.mxu0 %v688_v9  ;;  %p803_p4 = scmp.ne.s32.totalorder %s538_s14, %s802_s5  ;;  %p808_p6 = scmp.lt.s32.totalorder %s802_s5, %s802_s5 }
  0x59   :  { %v285_v44 = vxor.u32 %v284_v43, %v283_v42  ;;  %v409_v1 = vxor.u32 %v408_v63, %v407_v62 }
  0x5a   :  { %638 = vmatpush3.bf16.msra.mxu1 %v701_v22  ;;  %p809_p7 = por %p808_p6, %p807_p5 }
  0x5b   :  { %600 = vmatpush3.bf16.msra.mxu0 %v689_v10  ;;  %639 = vmatprep.subr.bf16.mxu1 %v838_v0  ;;  %v286_v45 = vmul.u32 2146121005, %v285_v44  ;;  %v410_v2 = vmul.u32 2146121005, %v409_v1 }
  0x5c   :  { %601 = vmatprep.subr.bf16.mxu0 %v690_v11  ;;  %p810_p8 = pnand %p809_p7, %p803_p4 }
  0x5d   :  { %v287_v46 = vshrl.u32 %v286_v45, 15  ;;  %v411_v3 = vshrl.u32 %v410_v2, 15 }
  0x5e   :  { %640 = vmatpush3.bf16.msra.mxu1 %v702_v24 }
  0x5f   :  { %602 = vmatpush3.bf16.msra.mxu0 %v691_v15  ;;  %641 = vmatprep.subr.bf16.mxu1 %v838_v0  ;;  %v288_v47 = vxor.u32 %v287_v46, %v286_v45  ;;  %v412_v4 = vxor.u32 %v411_v3, %v410_v2  ;;  %v579_v15 = vld [vmem:[%s992_s7] ss:$0 sm:$0xff] }
  0x60   :  { %603 = vmatprep.subr.bf16.mxu0 %v692_v16 }
  0x61   :  { %v289_v48 = vmul.u32 2221713035, %v288_v47  ;;  %v413_v5 = vmul.u32 2221713035, %v412_v4 }
  0x62   :  { %642 = vmatpush3.bf16.msra.mxu1 %v703_v25 }
  0x63   :  { %604 = vmatpush3.bf16.msra.mxu0 %v693_v18  ;;  %643 = vmatprep.subr.bf16.mxu1 %v838_v0  ;;  %v290_v49 = vshrl.u32 %v289_v48, 16  ;;  %v414_v6 = vshrl.u32 %v413_v5, 16 }
  0x64   :  { %605 = vmatprep.subr.bf16.mxu0 %v694_v19 }
  0x65   :  { %v291_v51 = vxor.u32 %v290_v49, %v289_v48  ;;  %v415_v7 = vxor.u32 %v414_v6, %v413_v5 }
  0x66   :  { %644 = vmatpush3.bf16.msra.mxu1 %v704_v26 }
  0x67   :  { %606 = vmatpush3.bf16.msra.mxu0 %v695_v21  ;;  %645 = vmatprep.subr.bf16.mxu1 %v838_v0  ;;  %vm292_vm1 = vcmp.lt.u32.totalorder %v291_v51, 1288490189  ;;  %vm416_vm3 = vcmp.lt.u32.totalorder %v415_v7, 1288490189 }
  0x68   :  { %651 = vmatprep.subr.bf16.mxu0 %v838_v0  ;;  %vm576_vm2 = vmpackc.low %vm292_vm1, %vm292_vm1 }
  0x69   :  { %vm588_vm4 = vmpackc.low %vm416_vm3, %vm416_vm3 }
  0x6a   :  { %263 = vmatmul.mubr.bf16.vlgmr.msra.gmra.mrb[0].mxu0 %v549_v23  ;;  %646 = vmatpush3.bf16.msra.mxu1 %v705_v27 }
  0x6b   :  { %667 = vmatprep.mubr.msk.bf16.mxu0 %vm839_vm0, %v838_v0  ;;  %652 = vmatpush3.bf16.msra.mxu0 %v706_v28 }
  0x6c   :  { %653 = vmatprep.subr.bf16.mxu0 %v838_v0 }
  0x6f   :  { %654 = vmatpush3.bf16.msra.mxu0 %v707_v29 }
  0x70   :  { %655 = vmatprep.subr.bf16.mxu0 %v838_v0 }
  0x73   :  { %656 = vmatpush3.bf16.msra.mxu0 %v708_v30 }
  0x74   :  { %657 = vmatprep.subr.bf16.mxu0 %v838_v0 }
  0x77   :  { %658 = vmatpush3.bf16.msra.mxu0 %v709_v31 }
  0x78   :  { %659 = vmatprep.subr.bf16.mxu0 %v838_v0 }
  0x7b   :  { %660 = vmatpush3.bf16.msra.mxu0 %v710_v32 }
  0x7c   :  { %661 = vmatprep.subr.bf16.mxu0 %v838_v0 }
  0x7f   :  { %662 = vmatpush3.bf16.msra.mxu0 %v711_v33 }
  0x80   :  { %663 = vmatprep.subr.bf16.mxu0 %v838_v0 }
  0x83   :  { %664 = vmatpush3.bf16.msra.mxu0 %v712_v60 }
  0x84   :  { %665 = vmatprep.subr.bf16.mxu0 %v838_v0 }
  0x87   :  { %666 = vmatpush3.bf16.msra.mxu0 %v713_v61 }
 0x13d   :  { %v607_v50 = vpop.f32.mrb[0].mxu0 }
 0x13e   :  { %v608_v53 = vpop.f32.mrb[1].mxu0 }
 0x13f   :  { %v609_v54 = vadd.f32 %v608_v53, %v607_v50  ;;  %v610_v55 = vpop.f32.mrb[2].mxu0 }
 0x140   :  { %v611_v56 = vpop.f32.mrb[3].mxu0 }
 0x141   :  { %v265_v57 = vadd.f32 %v609_v54, %v548_v52 }
 0x143   :  { %v270_v58 = vmax.f32 %v265_v57, 0.0 }
 0x145   :  { %v577_v59 = vpack.c.bf16 %v270_v58, %v270_v58 }
 0x147   :  { %648 = vmatmul.mubr.msk.bf16.vlgmr.msra.gmra.mrb[0].mxu1 %vm576_vm2, %v577_v59 }
 0x21a   :  { %v400_v9 = vpop.f32.mrb[0].mxu1 }
 0x21b   :  { %v401_v10 = vadd.f32 %v567_v8, %v400_v9  ;;  %v649_v11 = vpop.f32.mrb[1].mxu1 }
 0x21c   :  { %v403_v0 = vpop.f32.mrb[2].mxu1 }
 0x21d   :  { %v406_v12 = vmax.f32 %v401_v10, 0.0  ;;  %v650_v13 = vpop.f32.mrb[3].mxu1 }
 0x21f   :  { %v589_v14 = vpack.c.bf16 %v406_v12, %v406_v12 }
 0x221   :  { %668 = vmatmul.mubr.msk.bf16.vlgmr.msra.gmra.mrb[4].mxu0 %vm588_vm4, %v589_v14 }
 0x2f4   :  { %v524_v16 = vpop.f32.mrb[4].mxu0 }
 0x2f5   :  { %v525_v17 = vadd.f32 %v579_v15, %v524_v16  ;;  %v669_v18 = vpop.f32.mrb[5].mxu0 }
 0x2f6   :  { %v527_v19 = vpop.f32.mrb[6].mxu0 }
 0x2f7   :  { %530 = vst [vmem:[#allocation11] sm:$0xff] %v525_v17  ;;  %v670_v20 = vpop.f32.mrb[7].mxu0 }
 0x2f8   :  { %813 = shalt.err (!%p810_p8)
}
 0x2f9   :  { %s814_s7 = scalar_lea.hbm %s993_s8, 128 }
 0x2fa   :  { %p815_p9 = scmp.ne.s32.totalorder %s993_s8, %s814_s7  ;;  %p818_p10 = scmp.lt.u32.totalorder %s814_s7, %s993_s8 }
 0x2fc   :  { %p820_p11 = pnand %p818_p10, %p815_p9 }
 0x2fe   :  { %823 = shalt.err (!%p820_p11)
}
 0x2ff   :  { %540 = dma.vmem_to_hbm [thread:$0]  %s538_s14, 128, %s993_s8, [#allocation5]  }
 0x300   :  { %830 = dma.done.wait [#allocation5], 128  }
 0x301   :  { %831 = vsyncadd [#allocation5], 4294967168 }
 0x302   :  { %544 = vsyncpa [#allocation4], 1 }
 0x303   :  { %545 = vsyncpa [#allocation7], 1 }
 0x304   :  { %546 = vsyncpa [#allocation10], 1 }
 0x305   :  { %547 = vsyncpa [#allocation5], 1 }

</bundles_post_ra>
